<compile_context>
chip_gen: v5e
topology: v5e:2x2
jax: 0.10.0
libtpu: 0.0.40
codegen_flags: <defaults>
</compile_context>

<pallas_src>
import numpy as np
import jax
import jax.numpy as jnp
from jax.experimental import pallas as pl
from jax.experimental.pallas import tpu as pltpu

FEATS = ("spectrogram", "waveform", "pitch")
_RMS_EPS = 1e-8
_ROPE_THETA = 10000.0


# ----------------------------------------------------------------------------
# small helpers
# ----------------------------------------------------------------------------
def _round_up(x, m):
    return ((x + m - 1) // m) * m


def _vmem_limit_bytes(block_bytes):
    # Explicit scoped-VMEM request (perf review: re-derive the budget; v7x has
    # only 64 MiB physical VMEM, so never ask for more than that).
    return int(min(max(2 * block_bytes + (8 << 20), 32 << 20), 64 << 20))


def _rope_perms(D, head):
    """Output-channel permutations that turn the torch interleaved rotary layout
    into (A) [evens..., odds...] and (B) [odds..., evens...] per head."""
    hd = D // head
    assert D % head == 0 and hd % 2 == 0
    half = hd // 2
    pa, pb = [], []
    for h in range(head):
        base = h * hd
        ev = [base + 2 * i for i in range(half)]
        od = [base + 2 * i + 1 for i in range(half)]
        pa += ev + od
        pb += od + ev
    return np.asarray(pa), np.asarray(pb)


def _rope_tables(T, D, head, theta=_ROPE_THETA):
    """cos / signed-sin tables in the de-interleaved per-head layout, tiled to
    full width D so rotary is pure elementwise math inside the kernel."""
    hd = D // head
    half = hd // 2
    inv_freq = 1.0 / (theta ** (np.arange(0, hd, 2, dtype=np.float32) / hd))
    ang = np.arange(T, dtype=np.float32)[:, None] * inv_freq[None, :]       # (T, hd/2)
    cos, sin = np.cos(ang), np.sin(ang)
    cos_h = np.concatenate([cos, cos], axis=1)                              # (T, hd)
    nsin_h = np.concatenate([-sin, sin], axis=1)                            # (T, hd)
    return (jnp.asarray(np.tile(cos_h, (1, head)), dtype=jnp.float32),      # (T, D)
            jnp.asarray(np.tile(nsin_h, (1, head)), dtype=jnp.float32))


# ----------------------------------------------------------------------------
# Kernel 1: fused RMSNorm + Linear, row-tiled, stacked over modalities
# ----------------------------------------------------------------------------
def rmsnorm_linear(x_stack, g_stack, w_stack, b_stack, *, tm=256,
                   compute_dtype=jnp.bfloat16):
    """x_stack: (F, M, D); w_stack: (F, D, Dout) (already transposed for x@W);
    g_stack: (F, 1, D); b_stack: (F, 1, Dout). Returns (F, M, Dout)."""
    F_, M, D = x_stack.shape
    Dout = w_stack.shape[-1]

    # Big row tile (perf review #1), ragged-safe via padding (review concern #2).
    tm_eff = min(int(tm), _round_up(M, 8))
    tm_eff = max(8, (tm_eff // 8) * 8)
    Mp = _round_up(M, tm_eff)
    if Mp != M:
        x_stack = jnp.pad(x_stack, ((0, 0), (0, Mp - M), (0, 0)))

    def kernel(x_ref, g_ref, w_ref, b_ref, o_ref):
        x = x_ref[0]                                             # (tm, D) f32
        ms = jnp.mean(x * x, axis=-1, keepdims=True)
        xn = x * jax.lax.rsqrt(ms + _RMS_EPS) * g_ref[0]
        acc = jnp.dot(xn.astype(compute_dtype), w_ref[0].astype(compute_dtype),
                      preferred_element_type=jnp.float32)
        o_ref[0] = (acc + b_ref[0]).astype(o_ref.dtype)

    blk_bytes = 4 * (2 * tm_eff * (D + Dout) + D * Dout + D + 2 * Dout)
    out = pl.pallas_call(
        kernel,
        out_shape=jax.ShapeDtypeStruct((F_, Mp, Dout), x_stack.dtype),
        grid=(F_, Mp // tm_eff),
        in_specs=[
            pl.BlockSpec((1, tm_eff, D), lambda f, i: (f, i, 0)),
            pl.BlockSpec((1, 1, D), lambda f, i: (f, 0, 0)),
            pl.BlockSpec((1, D, Dout), lambda f, i: (f, 0, 0)),
            pl.BlockSpec((1, 1, Dout), lambda f, i: (f, 0, 0)),
        ],
        out_specs=pl.BlockSpec((1, tm_eff, Dout), lambda f, i: (f, i, 0)),
        compiler_params=pltpu.CompilerParams(
            dimension_semantics=("parallel", "parallel"),
            vmem_limit_bytes=_vmem_limit_bytes(blk_bytes)),
    )(x_stack, g_stack, w_stack, b_stack)
    return out[:, :M, :]


# ----------------------------------------------------------------------------
# Kernel 2: fused rotary cross-attention of one feature against its two peers
#           + residual + 3-way mean  (one pallas_call per feature, grid over B)
# ----------------------------------------------------------------------------
def cross_attention_fuse(xq, xa1, xa2, ap, cos, nsin, *, head,
                         compute_dtype=jnp.bfloat16):
    """xq is the feature's own projected tensor (query source AND residual),
    xa1/xa2 are the two other projected features (key/value sources).
    Returns attended = (xq + attn(xq,xa1) + attn(xq,xa2)) / 3, shape (B,T,D)."""
    B, T, D = xq.shape
    hd = D // head
    scale = float(hd) ** -0.25

    def kernel(xq_ref, xa1_ref, xa2_ref, cos_ref, nsin_ref,
               wq2_ref, bq2_ref, wkv_ref, bkv_ref, wo_ref, bo_ref, fz_ref,
               o_ref):
        x = xq_ref[0]                                            # (T, D) f32
        c = cos_ref[...]
        ns = nsin_ref[...]

        def mm(a, b):
            return jnp.dot(a.astype(compute_dtype), b.astype(compute_dtype),
                           preferred_element_type=jnp.float32)

        # q projection: one (D, 2D) matmul -> rotary A/B layouts, then rotary is
        # pure elementwise (no in-kernel de-interleave / roll / transpose).
        q2 = mm(x, wq2_ref[...]) + bq2_ref[...]                  # (T, 2D)
        q_rot = q2[:, :D] * c + q2[:, D:] * ns                   # (T, D)

        def attend(xa):
            # k(A), k(B), v in ONE (D, 3D) matmul (perf review #3: long-N fuse).
            kv = mm(xa, wkv_ref[...]) + bkv_ref[...]             # (T, 3D)
            k_rot = kv[:, :D] * c + kv[:, D:2 * D] * ns          # (T, D)
            v = kv[:, 2 * D:]                                    # (T, D)
            outs = []
            for h in range(head):                                # static unroll
                lo = h * hd
                qh = q_rot[:, lo:lo + hd] * scale
                # zscale: down-weight keys whose (rotated) first component is
                # exactly the pad token 0.0 (same math as the torch module);
                # folded into the key rows to avoid transposing a (T,1) slice.
                zs = jnp.where(k_rot[:, lo:lo + 1] == 0.0, fz_ref[...], 1.0)
                kh = k_rot[:, lo:lo + hd] * (scale * zs)
                s = jax.lax.dot_general(
                    qh.astype(compute_dtype), kh.astype(compute_dtype),
                    (((1,), (1,)), ((), ())),
                    preferred_element_type=jnp.float32)          # (T, T)
                s = s - jnp.max(s, axis=-1, keepdims=True)
                p = jnp.exp(s)
                w = p / jnp.sum(p, axis=-1, keepdims=True)
                outs.append(mm(w, v[:, lo:lo + hd]))             # (T, hd)
            return jnp.concatenate(outs, axis=-1)                # (T, D)

        wv = attend(xa1_ref[0]) + attend(xa2_ref[0])
        # output projection applied once to the summed wv (= o(wv1) + o(wv2))
        attn_out = mm(wv, wo_ref[...]) + 2.0 * bo_ref[...]
        o_ref[0] = ((x + attn_out) * (1.0 / 3.0)).astype(o_ref.dtype)

    row = pl.BlockSpec((1, T, D), lambda b: (b, 0, 0))

    def full(shp):
        return pl.BlockSpec(shp, lambda b, _s=shp: tuple(0 for _ in _s))

    blk_bytes = 4 * (2 * 4 * T * D + 6 * D * D + 6 * D + 2 * T * D)
    out = pl.pallas_call(
        kernel,
        out_shape=jax.ShapeDtypeStruct((B, T, D), xq.dtype),
        grid=(B,),
        in_specs=[row, row, row,
                  full((T, D)), full((T, D)),
                  full((D, 2 * D)), full((1, 2 * D)),
                  full((D, 3 * D)), full((1, 3 * D)),
                  full((D, D)), full((1, D)),
                  full((1, 1))],
        out_specs=row,
        compiler_params=pltpu.CompilerParams(
            dimension_semantics=("parallel",),
            vmem_limit_bytes=_vmem_limit_bytes(blk_bytes)),
    )(xq, xa1, xa2, cos, nsin,
      ap["wq2"], ap["bq2"], ap["wkv"], ap["bkv"], ap["wo"], ap["bo"], ap["fzero"])
    return out


# ----------------------------------------------------------------------------
# Parameters (raw torch-layout) and kernel-layout preparation
# ----------------------------------------------------------------------------
def init_params(key, D, head):
    def xavier(k, shape):
        fan_out, fan_in = shape
        lim = (6.0 / (fan_in + fan_out)) ** 0.5
        return jax.random.uniform(k, shape, jnp.float32, -lim, lim)

    keys = iter(jax.random.split(key, 64))
    params = {"proj": {}, "attn": {}}
    for f in FEATS:
        params["proj"][f] = {
            "gamma": jnp.ones((D,), jnp.float32),                 # RMSNorm weight
            "w": xavier(next(keys), (D, D)),                      # torch (out, in)
            "b": 0.02 * jax.random.normal(next(keys), (D,), jnp.float32),
        }
        params["attn"][f] = {
            "wq": xavier(next(keys), (D, D)),
            "bq": 0.02 * jax.random.normal(next(keys), (D,), jnp.float32),
            "wk": xavier(next(keys), (D, D)),                     # no bias
            "wv": xavier(next(keys), (D, D)),
            "bv": 0.02 * jax.random.normal(next(keys), (D,), jnp.float32),
            "wo": xavier(next(keys), (D, D)),
            "bo": 0.02 * jax.random.normal(next(keys), (D,), jnp.float32),
            "fzero": 1e-4,
        }
    params["out_gamma"] = jnp.ones((D,), jnp.float32)
    params["out_w"] = xavier(next(keys), (D, D))
    params["out_b"] = 0.02 * jax.random.normal(next(keys), (D,), jnp.float32)
    return params


def prepare_kernel_params(params, D, head):
    """Host-side re-layout: transpose for x@W, permute q/k output channels for
    de-interleaved rotary, fuse [kA|kB|v] and [qA|qB] weight blocks."""
    pa, pb = _rope_perms(D, head)
    kp = {"proj": {}, "attn": {}}
    for f in FEATS:
        pp = params["proj"][f]
        kp["proj"][f] = {"gamma": pp["gamma"][None, :], "w": pp["w"].T,
                         "b": pp["b"][None, :]}
        ap = params["attn"][f]
        wq2 = jnp.concatenate([ap["wq"][pa].T, ap["wq"][pb].T], axis=1)       # (D,2D)
        bq2 = jnp.concatenate([ap["bq"][pa], ap["bq"][pb]])[None, :]          # (1,2D)
        wkv = jnp.concatenate([ap["wk"][pa].T, ap["wk"][pb].T, ap["wv"].T],
                              axis=1)                                         # (D,3D)
        bkv = jnp.concatenate([jnp.zeros((2 * D,), jnp.float32),
                               ap["bv"]])[None, :]                            # (1,3D)
        fz = jnp.clip(jax.nn.softplus(jnp.float32(ap["fzero"])),
                      1e-6, 1e-3).reshape(1, 1)
        kp["attn"][f] = {"wq2": wq2, "bq2": bq2, "wkv": wkv, "bkv": bkv,
                         "wo": ap["wo"].T, "bo": ap["bo"][None, :], "fzero": fz}
    kp["out"] = {"gamma": params["out_gamma"][None, :],
                 "w": params["out_w"].T, "b": params["out_b"][None, :]}
    return kp


# ----------------------------------------------------------------------------
# Module forward (Pallas path)
# ----------------------------------------------------------------------------
def feature_fusion_forward(features, kparams, *, head=4, tm=256,
                           compute_dtype=jnp.bfloat16):
    if len(features) <= 1:                      # mirrors the torch early return
        return next(iter(features.values()))
    feats = [f for f in FEATS if f in features]
    # TODO(synk): handle the 2-modality case (single cross-attention per feature).
    assert len(feats) == 3, "fused kernel expects all three modalities"

    B, T, D = features[feats[0]].shape
    M = B * T

    # 1) three RMSNorm+Linear projections in ONE pallas_call (stacked inputs)
    x_stack = jnp.stack([features[f].reshape(M, D) for f in feats])
    g_stack = jnp.stack([kparams["proj"][f]["gamma"] for f in feats])
    w_stack = jnp.stack([kparams["proj"][f]["w"] for f in feats])
    b_stack = jnp.stack([kparams["proj"][f]["b"] for f in feats])
    proj_stack = rmsnorm_linear(x_stack, g_stack, w_stack, b_stack,
                                tm=tm, compute_dtype=compute_dtype)
    proj = {f: proj_stack[i].reshape(B, T, D) for i, f in enumerate(feats)}

    # 2) shared rotary tables (dims = head_dim, theta = 10000)
    cos, nsin = _rope_tables(T, D, head)

    # 3) per-feature: both cross-attentions + residual + mean, fused
    attended = {}
    for f in feats:
        o1, o2 = [g for g in feats if g != f]
        attended[f] = cross_attention_fuse(proj[f], proj[o1], proj[o2],
                                           kparams["attn"][f], cos, nsin,
                                           head=head, compute_dtype=compute_dtype)

    # 4) combined = output_projection(output_norm(attended[reference]))
    ref_feat = "spectrogram" if "spectrogram" in attended else feats[0]
    combined = rmsnorm_linear(attended[ref_feat].reshape(1, M, D),
                              kparams["out"]["gamma"][None],
                              kparams["out"]["w"][None],
                              kparams["out"]["b"][None],
                              tm=tm, compute_dtype=compute_dtype)[0].reshape(B, T, D)
    return {"combined": combined, **attended}


# ----------------------------------------------------------------------------
# Pure-JAX reference (direct transcription of the torch forward)
# ----------------------------------------------------------------------------
def _reference_rmsnorm(x, g, eps=_RMS_EPS):
    ms = jnp.mean(jnp.square(x), axis=-1, keepdims=True)
    return x * jax.lax.rsqrt(ms + eps) * g


def _reference_mha(x, xa, p, head):
    B, T, D = x.shape
    hd = D // head
    q = x @ p["wq"].T + p["bq"]
    k = xa @ p["wk"].T
    v = xa @ p["wv"].T + p["bv"]

    def heads(t):
        return t.reshape(B, T, head, hd).transpose(0, 2, 1, 3)

    q, k, v = heads(q), heads(k), heads(v)
    inv = 1.0 / (_ROPE_THETA ** (jnp.arange(0, hd, 2, dtype=jnp.float32) / hd))
    ang = jnp.arange(T, dtype=jnp.float32)[:, None] * inv[None, :]
    cos, sin = jnp.cos(ang), jnp.sin(ang)

    def rot(t):
        tr = t.reshape(B, head, T, hd // 2, 2)
        te, to = tr[..., 0], tr[..., 1]
        return jnp.stack([te * cos - to * sin, te * sin + to * cos],
                         axis=-1).reshape(B, head, T, hd)

    q, k = rot(q), rot(k)
    scale = hd ** -0.25
    qk = jnp.einsum("bhqd,bhkd->bhqk", q * scale, k * scale)
    fz = jnp.clip(jax.nn.softplus(jnp.float32(p["fzero"])), 1e-6, 1e-3)
    zscale = jnp.where(k[..., 0] == 0.0, fz, 1.0)
    qk = qk * zscale[:, :, None, :]
    w = jax.nn.softmax(qk, axis=-1)
    wv = jnp.einsum("bhqk,bhkd->bhqd", w, v)
    wv = wv.transpose(0, 2, 1, 3).reshape(B, T, D)
    return wv @ p["wo"].T + p["bo"]


def reference_forward(features, params, head=4):
    proj = {}
    for f in FEATS:
        pp = params["proj"][f]
        proj[f] = _reference_rmsnorm(features[f], pp["gamma"]) @ pp["w"].T + pp["b"]
    attended = {}
    for f in FEATS:
        acc = proj[f]
        for g in FEATS:
            if g != f:
                acc = acc + _reference_mha(proj[f], proj[g], params["attn"][f], head)
        attended[f] = acc / 3.0
    combined = (_reference_rmsnorm(attended["spectrogram"], params["out_gamma"])
                @ params["out_w"].T + params["out_b"])
    return {"combined": combined, **attended}


# ----------------------------------------------------------------------------
if __name__ == "__main__":
    # dims=128 keeps every last dim lane-dense (perf review: D multiple of 128);
    # head=4 -> head_dim=32.  Small B/T keep the demo cheap.
    B, T, D, HEAD = 2, 8, 128, 4
    key = jax.random.PRNGKey(0)
    k1, k2, k3, kp = jax.random.split(key, 4)
    features = {
        "spectrogram": jax.random.normal(k1, (B, T, D), jnp.float32),
        "waveform": jax.random.normal(k2, (B, T, D), jnp.float32),
        "pitch": jax.random.normal(k3, (B, T, D), jnp.float32),
    }
    params = init_params(kp, D, HEAD)
    kparams = prepare_kernel_params(params, D, HEAD)

    # f32-operand MXU path: tight check against the high-precision reference.
    out_f32 = feature_fusion_forward(features, kparams, head=HEAD, tm=256,
                                     compute_dtype=jnp.float32)
    out_f32 = jax.block_until_ready(out_f32)

    with jax.default_matmul_precision("float32"):
        ref = reference_forward(features, params, head=HEAD)
    ref = jax.block_until_ready(ref)

    for name in ("combined",) + FEATS:
        assert out_f32[name].shape == (B, T, D), name
        assert jnp.allclose(out_f32[name], ref[name], atol=5e-2, rtol=5e-2), name

    # bf16-operand MXU path (the performance default): loose sanity check.
    out_bf16 = feature_fusion_forward(features, kparams, head=HEAD, tm=256,
                                      compute_dtype=jnp.bfloat16)
    out_bf16 = jax.block_until_ready(out_bf16)
    for name in ("combined",) + FEATS:
        assert jnp.allclose(out_bf16[name], ref[name], atol=1.5e-1, rtol=1.5e-1), name

    print("KERNEL_OK")
</pallas_src>

<mosaic_0001>
module attributes {stable_mosaic.version = 11 : i64} {
  func.func @kernel(%arg0: i32, %arg1: i32, %arg2: memref<1x16x128xf32, #tpu.memory_space<vmem>>, %arg3: memref<1x1x128xf32, #tpu.memory_space<vmem>>, %arg4: memref<1x128x128xf32, #tpu.memory_space<vmem>>, %arg5: memref<1x1x128xf32, #tpu.memory_space<vmem>>, %arg6: memref<1x16x128xf32, #tpu.memory_space<vmem>>) attributes {dimension_semantics = [#tpu.dimension_semantics<parallel>, #tpu.dimension_semantics<parallel>], iteration_bounds = array<i64: 3, 1>, scalar_prefetch = 0 : i64, scratch_operands = 0 : i64, tpu.core_type = #tpu.core_type<tc>, window_params = [{transform_indices = @transform_0, window_bounds = array<i64: 1, 16, 128>}, {transform_indices = @transform_1, window_bounds = array<i64: 1, 1, 128>}, {transform_indices = @transform_2, window_bounds = array<i64: 1, 128, 128>}, {transform_indices = @transform_3, window_bounds = array<i64: 1, 1, 128>}, {transform_indices = @transform_4, window_bounds = array<i64: 1, 16, 128>}]} {
    %c0 = arith.constant 0 : index
    %c0_0 = arith.constant 0 : index
    %c0_1 = arith.constant 0 : index
    %0 = vector.load %arg2[%c0, %c0_0, %c0_1] : memref<1x16x128xf32, #tpu.memory_space<vmem>>, vector<1x16x128xf32>
    %1 = vector.shape_cast %0 : vector<1x16x128xf32> to vector<16x128xf32>
    %2 = arith.mulf %1, %1 : vector<16x128xf32>
    %cst = arith.constant dense<0.000000e+00> : vector<16xf32>
    %3 = vector.multi_reduction <add>, %2, %cst [1] : vector<16x128xf32> to vector<16xf32>
    %4 = vector.shape_cast %3 : vector<16xf32> to vector<16x1xf32>
    %cst_2 = arith.constant 1.280000e+02 : f32
    %5 = vector.broadcast %cst_2 : f32 to vector<16x1xf32>
    %6 = arith.divf %4, %5 : vector<16x1xf32>
    %cst_3 = arith.constant 9.99999993E-9 : f32
    %7 = vector.broadcast %cst_3 : f32 to vector<16x1xf32>
    %8 = arith.addf %6, %7 : vector<16x1xf32>
    %9 = math.rsqrt %8 : vector<16x1xf32>
    %10 = vector.broadcast %9 : vector<16x1xf32> to vector<16x128xf32>
    %11 = arith.mulf %1, %10 : vector<16x128xf32>
    %c0_4 = arith.constant 0 : index
    %c0_5 = arith.constant 0 : index
    %c0_6 = arith.constant 0 : index
    %12 = vector.load %arg3[%c0_4, %c0_5, %c0_6] : memref<1x1x128xf32, #tpu.memory_space<vmem>>, vector<1x1x128xf32>
    %13 = vector.shape_cast %12 : vector<1x1x128xf32> to vector<1x128xf32>
    %14 = vector.broadcast %13 : vector<1x128xf32> to vector<16x128xf32>
    %15 = arith.mulf %11, %14 : vector<16x128xf32>
    %c0_7 = arith.constant 0 : index
    %c0_8 = arith.constant 0 : index
    %c0_9 = arith.constant 0 : index
    %16 = vector.load %arg4[%c0_7, %c0_8, %c0_9] : memref<1x128x128xf32, #tpu.memory_space<vmem>>, vector<1x128x128xf32>
    %17 = vector.shape_cast %16 : vector<1x128x128xf32> to vector<128x128xf32>
    %cst_10 = arith.constant dense<0.000000e+00> : vector<16x128xf32>
    %18 = tpu.matmul %15, %17, %cst_10 {dimension_numbers = #tpu.dot_dimension_numbers<[1], [0], [0], [1], [0, 0, 1, 1], [], []>} : vector<16x128xf32>, vector<128x128xf32>, vector<16x128xf32> -> vector<16x128xf32>
    %c0_11 = arith.constant 0 : index
    %c0_12 = arith.constant 0 : index
    %c0_13 = arith.constant 0 : index
    %19 = vector.load %arg5[%c0_11, %c0_12, %c0_13] : memref<1x1x128xf32, #tpu.memory_space<vmem>>, vector<1x1x128xf32>
    %20 = vector.shape_cast %19 : vector<1x1x128xf32> to vector<1x128xf32>
    %21 = vector.broadcast %20 : vector<1x128xf32> to vector<16x128xf32>
    %22 = arith.addf %18, %21 : vector<16x128xf32>
    %c0_14 = arith.constant 0 : index
    %c0_15 = arith.constant 0 : index
    %c0_16 = arith.constant 0 : index
    %23 = vector.load %arg6[%c0_14, %c0_15, %c0_16] : memref<1x16x128xf32, #tpu.memory_space<vmem>>, vector<1x16x128xf32>
    %24 = vector.shape_cast %23 : vector<1x16x128xf32> to vector<16x128xf32>
    %25 = vector.shape_cast %22 : vector<16x128xf32> to vector<1x16x128xf32>
    tpu.vector_store %arg6[%c0_14, %c0_15, %c0_16], %25 {strides = array<i32>} : memref<1x16x128xf32, #tpu.memory_space<vmem>>, vector<1x16x128xf32>,
    return
  }
  func.func @transform_0(%arg0: i32, %arg1: i32) -> (i32, i32, i32) {
    %c0_i32 = arith.constant 0 : i32
    %c0_i32_0 = arith.constant 0 : i32
    return %arg0, %arg1, %c0_i32 : i32, i32, i32
  }
  func.func @transform_1(%arg0: i32, %arg1: i32) -> (i32, i32, i32) {
    %c0_i32 = arith.constant 0 : i32
    %c0_i32_0 = arith.constant 0 : i32
    %c0_i32_1 = arith.constant 0 : i32
    return %arg0, %c0_i32, %c0_i32_0 : i32, i32, i32
  }
  func.func @transform_2(%arg0: i32, %arg1: i32) -> (i32, i32, i32) {
    %c0_i32 = arith.constant 0 : i32
    %c0_i32_0 = arith.constant 0 : i32
    %c0_i32_1 = arith.constant 0 : i32
    return %arg0, %c0_i32, %c0_i32_0 : i32, i32, i32
  }
  func.func @transform_3(%arg0: i32, %arg1: i32) -> (i32, i32, i32) {
    %c0_i32 = arith.constant 0 : i32
    %c0_i32_0 = arith.constant 0 : i32
    %c0_i32_1 = arith.constant 0 : i32
    return %arg0, %c0_i32, %c0_i32_0 : i32, i32, i32
  }
  func.func @transform_4(%arg0: i32, %arg1: i32) -> (i32, i32, i32) {
    %c0_i32 = arith.constant 0 : i32
    %c0_i32_0 = arith.constant 0 : i32
    return %arg0, %arg1, %c0_i32 : i32, i32, i32
  }
}

</mosaic_0001>

<bundles_post_ra>
// kernel: tpu_custom_call.1
= control target key start
LH: loop header
LB: loop body
LE: loop exit
PB: predicated region body
PF: predicated region fallthrough
CT: control target
= control target key end

     0   :  { %s1186_s0 = inlined_call_operand.hbm [shape: f32[3,16,128], index: 0, kind: input, shape index: {}]   ;;  %s1187_s1 = inlined_call_operand.hbm [shape: f32[3,1,128], index: 1, kind: input, shape index: {}]   ;;  %s1188_s2 = inlined_call_operand.hbm [shape: f32[3,128,128], index: 2, kind: input, shape index: {}]   ;;  %s1189_s3 = inlined_call_operand.hbm [shape: f32[3,1,128], index: 3, kind: input, shape index: {}]   ;;  %s1190_s4 = inlined_call_operand.hbm [shape: f32[3,16,128], index: 4, kind: output, shape index: {}]  }
   0x1   :  { %1195 = sst [smem:[#allocation20_spill]] %s1186_s0 }
   0x2   :  { %1196 = sst [smem:[#allocation21_spill]] %s1187_s1 }
   0x3   :  { %9 = vsyncpa [#allocation3], 0 }
   0x4   :  { %11 = vsyncpa [#allocation3 + $0x1], 0 }
   0x5   :  { %12 = vsyncpa [#allocation6], 0 }
   0x6   :  { %14 = vsyncpa [#allocation6 + $0x1], 0 }
   0x7   :  { %15 = vsyncpa [#allocation9], 0 }
   0x8   :  { %17 = vsyncpa [#allocation9 + $0x1], 0 }
   0x9   :  { %18 = vsyncpa [#allocation4], 0 }
   0xa   :  { %20 = vsyncpa [#allocation4 + $0x1], 0  ;;  %s972_s15 = smov 0   ;;  %s974_s16 = smov 0  }
   0xb   :  { %s976_s17 = smov 0   ;;  %s978_s18 = smov 0  }
   0xc   :  { %s980_s19 = smov 0   ;;  %s982_s20 = smov 0  }
   0xd LB: > { %1197 = sst [smem:[#allocation15_spill]] %s920_s15  ;;  %s1003_s21 = sadd.s32 4294967295, %s940_s20   ;;  %s940_s20 = sphi %s982_s20, %s26_s20   ;;  %s936_s19 = sphi %s980_s19, %s1218_s19   ;;  %s932_s18 = sphi %s978_s18, %s1217_s18   ;;  %s928_s17 = sphi %s976_s17, %s1213_s17   ;;  %s924_s16 = sphi %s974_s16, %s1216_s16   ;;  %s920_s15 = sphi %s972_s15, %s1215_s15  }
   0xe   : > { %1198 = sst [smem:[#allocation16_spill]] %s928_s17  ;;  %s603_s22 = sadd.s32 4294967294, %s940_s20  }
   0xf   : > { %s38_s23 = sadd.s32 1, %s936_s19  ;;  %s47_s24 = sadd.s32 1, %s928_s17 }
  0x10   : > { %p40_p0 = scmp.ge.s32.totalorder %s38_s23, 3  ;;  %p54_p1 = scmp.ne.s32.totalorder %s928_s17, %s924_s16 }
  0x11   : > { %p55_p2 = scmp.eq.s32.totalorder %s940_s20, 0  ;;  %p60_p3 = scmp.ne.s32.totalorder %s924_s16, %s920_s15 }
  0x12   : > { %s1220_s23 = smov (%p40_p0, %s38_s23), 0  ;;  %p61_p5 = scmp.eq.s32.totalorder %s1003_s21, 0 }
  0x13   : > { %1199 = sst [smem:[#allocation17_spill]] %s1220_s23  ;;  %p1015_p4 = por %p55_p2, %p54_p1 }
  0x14   : > { %s42_s26 = ssub.s32 %s936_s19, %s1220_s23  ;;  %p164_p6 = scmp.eq.s32.totalorder %s1003_s21, 2 }
  0x15   : > { %p45_p7 = scmp.eq.s32.totalorder %s42_s26, 0  ;;  %p1023_p8 = por %p61_p5, %p60_p3 }
  0x16   : > { %p1027_p9 = por %p164_p6, %p54_p1  ;;  %p170_p10 = scmp.eq.s32.totalorder %s603_s22, 2 }
  0x17   : > { %s1032_s29 = scalar_select %p45_p7, %s928_s17, %s47_s24  }
  0x18   : > { %p1034_p11 = por %p170_p10, %p60_p3  ;;  %p667_p12 = scmp.lt.s32.totalorder %s940_s20, 3 }
  0x19   : > { %1203 = sst [smem:[#allocation18_spill]] %s1032_s29  ;;  %s1040_s5 = sand.u32 1, %s928_s17  }
  0x1a   : > { %s1204_s30 = scalar_select %p1034_p11, 1, 0 }
  0x1b   : > { %s214_s6 = sand.u32 1, %s940_s20   ;;  %p1045_p13 = pnand %p667_p12, %p1015_p4 }
  0x1c   : > { %1205 = sst [smem:[#allocation19_spill]] %s1204_s30  ;;  %s217_s11 = scalar_lea.vmem [#allocation5], %s1040_s5 }
  0x1d   : > { %s1207_s1 = sld [smem:[#allocation21_spill]]  ;;  %s224_s12 = sshll.u32 %s217_s11, 4  ;;  %s225_s12 = int_to_ptr.vmem [resolvable:$true] %s224_s12 }
  0x1e   : > { %s1054_s14 = scalar_lea.sflag [#allocation6], %s214_s6  ;;  %p612_p0 = scmp.ge.s32.totalorder %s940_s20, 1 }
  0x1f   : > { %p268_p1 = scmp.lt.s32.totalorder %s940_s20, 4  ;;  %s606_s24 = sshll.u32 %s1040_s5, 4 }
  0x20   : > { %s621_s25 = sshll.u32 %s936_s19, 4  ;;  %s1209_s0 = sld [smem:[#allocation20_spill]] }
  0x21   : > { %p1061_p2 = pnand %p612_p0, %p268_p1  ;;  %s609_s23 = sshll.u32 %s1040_s5, 7 }
  0x22   : > { %s622_s29 = sshll.u32 %s936_s19, 7  ;;  %s259_s30 = scalar_lea.hbm %s1189_s3, %s936_s19 }
  0x23   : > { %s220_s10 = scalar_lea.hbm %s1207_s1, %s936_s19  ;;  %s943_s1 = smov 8  }
  0x24   : > { %s222_s13 = sshll.u32 %s220_s10, 4  ;;  %s194_s10 = scalar_lea.vmem [#allocation2], %s606_s24  ;;  %s223_s13 = int_to_ptr.hbm [resolvable:$true] %s222_s13 }
  0x25   : > { %656 = dma.hbm_to_vmem [thread:$0]  (!%p1045_p13), %s223_s13, 16, %s225_s12, %s1054_s14  }
  0x26   : > { %s201_s9 = scalar_lea.hbm %s1209_s0, %s621_s25  ;;  %s204_s11 = sshll.u32 %s194_s10, 4  ;;  %s205_s11 = int_to_ptr.vmem [resolvable:$true] %s204_s11 }
  0x27   : > { %s202_s6 = sshll.u32 %s201_s9, 4  ;;  %s191_s12 = scalar_lea.sflag [#allocation3], %s1040_s5  ;;  %s203_s6 = int_to_ptr.hbm [resolvable:$true] %s202_s6 }
  0x28   : > { %s942_s13 = smov 128   ;;  %s240_s24 = scalar_lea.hbm %s1188_s2, %s622_s29 }
  0x29   : > { %653 = dma.hbm_to_vmem [thread:$0]  (!%p1045_p13), %s203_s6, 256, %s205_s11, %s191_s12, %s942_s13, %s942_s13, %s943_s1  }
  0x2a   : > { %s241_s8 = sshll.u32 %s240_s24, 4  ;;  %s235_s9 = scalar_lea.vmem [#allocation7], %s609_s23  ;;  %s242_s8 = int_to_ptr.hbm [resolvable:$true] %s241_s8 }
  0x2b   : > { %s243_s10 = sshll.u32 %s235_s9, 4  ;;  %s256_s6 = scalar_lea.vmem [#allocation8], %s1040_s5  ;;  %s244_s10 = int_to_ptr.vmem [resolvable:$true] %s243_s10 }
  0x2c   : > { %659 = dma.hbm_to_vmem [thread:$0]  (!%p1045_p13), %s242_s8, 2048, %s244_s10, %s1054_s14, %s942_s13, %s942_s13, %s943_s1  }
  0x2d   : > { %s263_s11 = sshll.u32 %s256_s6, 4  ;;  %s261_s12 = sshll.u32 %s259_s30, 4  ;;  %s264_s11 = int_to_ptr.vmem [resolvable:$true] %s263_s11  ;;  %s262_s12 = int_to_ptr.hbm [resolvable:$true] %s261_s12 }
  0x2e   : > { %s254_s15 = scalar_lea.sflag [#allocation9], %s1040_s5  ;;  %272 = sbr.rel (%p1061_p2) target bundleno = 343 (0x157), region = 36 }
  0x2f   : > { %662 = dma.hbm_to_vmem [thread:$0]  (!%p1045_p13), %s262_s12, 16, %s264_s11, %s254_s15  }
  0x30   : > { %s1092_s23 = sand.u32 (!%p1061_p2), 1, %s924_s16  }
  0x31   : > { %s613_s0 = sshll.u32 (!%p1061_p2), %s1092_s23, 4  ;;  %s275_s1 = scalar_lea.sflag (!%p1061_p2), [#allocation3], %s1092_s23 }
  0x32   : > { %s278_s17 = scalar_lea.vmem (!%p1061_p2), [#allocation2], %s613_s0 }
  0x33   : > { %903 = dma.done.wait (%p1023_p8), %s275_s1, 256  }
  0x34   : > { %905 = vsyncadd (%p1023_p8), %s275_s1, 4294967040  ;;  %s284_s15 = sand.u32 1, %s1003_s21   ;;  %s287_s30 = scalar_lea.vmem [#allocation5], %s1092_s23 }
  0x35   : > { %s285_s29 = scalar_lea.sflag [#allocation6], %s284_s15 }
  0x36   : > { %907 = dma.done.wait (%p1023_p8), %s285_s29, 2064  }
  0x37   : > { %909 = vsyncadd (%p1023_p8), %s285_s29, 4294965232  ;;  %s614_s5 = sshll.u32 %s1092_s23, 7  ;;  %s304_s14 = scalar_lea.sflag [#allocation9], %s1092_s23 }
  0x38   : > { %s1109_s7 = scalar_lea.vmem [#allocation7], %s614_s5  ;;  %s306_s22 = scalar_lea.vmem [#allocation8], %s1092_s23 }
  0x39   : > { %911 = dma.done.wait (%p1023_p8), %s304_s14, 16  }
  0x3a   : > { %913 = vsyncadd (%p1023_p8), %s304_s14, 4294967280  ;;  %v1117_v0 = vld [vmem:[%s278_s17] sm:$0xff]  ;;  %v1124_v5 = vld [vmem:[%s278_s17 + $0x8] sm:$0xff]  ;;  %v944_v9 = vmov 128.0   ;;  %s623_s21 = sshll.u32 %s932_s18, 4  ;;  %s344_s25 = scalar_lea.vmem [#allocation10], %s613_s0 }
  0x3b   : > { %v409_v1 = vld [vmem:[%s1109_s7 + $0x78] sm:$0xff]  ;;  %v349_v2 = vmul.f32 %v1117_v0, %v1117_v0  ;;  %v408_v3 = vld [vmem:[%s1109_s7 + $0x70] sm:$0xff]  ;;  %v407_v4 = vld [vmem:[%s1109_s7 + $0x68] sm:$0xff]  ;;  %v350_v6 = vmul.f32 %v1124_v5, %v1124_v5  ;;  %724 = vrcp.f32 %v944_v9  ;;  %s453_s26 = scalar_lea.hbm %s1190_s4, %s623_s21  ;;  %s454_s24 = sshll.u32 %s344_s25, 4  ;;  %s455_s24 = int_to_ptr.vmem [resolvable:$true] %s454_s24 }
  0x3c   : > { %414 = vmatpush.msra.mxu0 %v409_v1  ;;  %624 = vmatpush.msra.mxu1 %v409_v1  ;;  %v406_v7 = vld [vmem:[%s1109_s7 + $0x60] sm:$0xff]  ;;  %v405_v8 = vld [vmem:[%s1109_s7 + $0x58] sm:$0xff]  ;;  %v404_v10 = vld [vmem:[%s1109_s7 + $0x50] sm:$0xff]  ;;  %s456_s8 = sshll.u32 %s453_s26, 4  ;;  %s440_s9 = scalar_lea.sflag [#allocation4], %s1092_s23  ;;  %s457_s8 = int_to_ptr.hbm [resolvable:$true] %s456_s8 }
  0x3d   : > { %351 = vadd.xlane.f32.xlu0 %v349_v2  ;;  %v403_v11 = vld [vmem:[%s1109_s7 + $0x48] sm:$0xff]  ;;  %v402_v12 = vld [vmem:[%s1109_s7 + $0x40] sm:$0xff]  ;;  %v401_v14 = vld [vmem:[%s1109_s7 + $0x38] sm:$0xff]  ;;  %s864_s10 = sshra.s32 %s457_s8, 4  ;;  %s870_s12 = scalar_lea.hbm %s1190_s4, 48  ;;  %s865_s10 = int_to_ptr.hbm [resolvable:$true] %s864_s10 }
  0x3e   : > { %415 = vmatpush.msra.mxu0 %v408_v3  ;;  %625 = vmatpush.msra.mxu1 %v408_v3  ;;  %v400_v15 = vld [vmem:[%s1109_s7 + $0x30] sm:$0xff]  ;;  %v399_v17 = vld [vmem:[%s1109_s7 + $0x28] sm:$0xff]  ;;  %v398_v18 = vld [vmem:[%s1109_s7 + $0x20] sm:$0xff]  ;;  %s866_s18 = scalar_lea.hbm %s865_s10, 16  ;;  %p871_p6 = scmp.lt.s32.totalorder %s865_s10, %s1190_s4 }
  0x3f   : > { %v397_v20 = vld [vmem:[%s1109_s7 + $0x18] sm:$0xff]  ;;  %v396_v21 = vld [vmem:[%s1109_s7 + $0x10] sm:$0xff]  ;;  %v395_v23 = vld [vmem:[%s1109_s7 + $0x8] sm:$0xff]  ;;  %p867_p3 = scmp.ne.s32.totalorder %s865_s10, %s866_s18  ;;  %p872_p7 = scmp.lt.s32.totalorder %s870_s12, %s866_s18 }
  0x40   : > { %416 = vmatpush.msra.mxu0 %v407_v4  ;;  %626 = vmatpush.msra.mxu1 %v407_v4  ;;  %v394_v24 = vld [vmem:[%s1109_s7] sm:$0xff]  ;;  %v722_v41 = vld [vmem:[%s287_s30] ss:$0 sm:$0xff] }
  0x41   : > { %v725_v13 = vpop.eup %724  ;;  %v723_v52 = vld [vmem:[%s306_s22] ss:$0 sm:$0xff]  ;;  %p868_p4 = pnand %p867_p3, %p1027_p9  ;;  %p873_p8 = por %p872_p7, %p871_p6 }
  0x42   : > { %417 = vmatpush.msra.mxu0 %v406_v7  ;;  %627 = vmatpush.msra.mxu1 %v406_v7  ;;  %v356_v16 = vmul.f32 128.0, %v725_v13  ;;  %vm360_vm0 = vweird.f32 %v725_v13 }
  0x43   : > { %p869_p5 = pneg %p868_p4 }
  0x44   : > { %418 = vmatpush.msra.mxu0 %v405_v8  ;;  %628 = vmatpush.msra.mxu1 %v405_v8  ;;  %v357_v19 = vsub.f32 1.0, %v356_v16 }
  0x45   : > { %353 = vadd.xlane.f32.xlu0 %v350_v6  ;;  %p874_p10 = pnand %p873_p8, %p869_p5 }
  0x46   : > { %419 = vmatpush.msra.mxu0 %v404_v10  ;;  %629 = vmatpush.msra.mxu1 %v404_v10  ;;  %v358_v22 = vmul.f32 %v725_v13, %v357_v19 }
  0x48   : > { %420 = vmatpush.msra.mxu0 %v403_v11  ;;  %630 = vmatpush.msra.mxu1 %v403_v11  ;;  %v359_v25 = vadd.f32 %v725_v13, %v358_v22 }
  0x4a   : > { %421 = vmatpush.msra.mxu0 %v402_v12  ;;  %631 = vmatpush.msra.mxu1 %v402_v12  ;;  %v361_v26 = vsel %vm360_vm0, %v725_v13, %v359_v25 }
  0x4c   : > { %422 = vmatpush.msra.mxu0 %v401_v14  ;;  %632 = vmatpush.msra.mxu1 %v401_v14 }
  0x4e   : > { %423 = vmatpush.msra.mxu0 %v400_v15  ;;  %633 = vmatpush.msra.mxu1 %v400_v15 }
  0x50   : > { %424 = vmatpush.msra.mxu0 %v399_v17  ;;  %634 = vmatpush.msra.mxu1 %v399_v17 }
  0x52   : > { %425 = vmatpush.msra.mxu0 %v398_v18  ;;  %635 = vmatpush.msra.mxu1 %v398_v18 }
  0x54   : > { %426 = vmatpush.msra.mxu0 %v397_v20  ;;  %636 = vmatpush.msra.mxu1 %v397_v20 }
  0x56   : > { %427 = vmatpush.msra.mxu0 %v396_v21  ;;  %637 = vmatpush.msra.mxu1 %v396_v21 }
  0x58   : > { %428 = vmatpush.msra.mxu0 %v395_v23  ;;  %638 = vmatpush.msra.mxu1 %v395_v23 }
  0x5a   : > { %429 = vmatpush.msra.mxu0 %v394_v24  ;;  %639 = vmatpush.msra.mxu1 %v394_v24 }
  0xb0   : > { %v352_v27 = vpop.xlane.xlu0 %351 }
  0xb1   : > { %v362_v28 = vmul.f32 %v361_v26, %v352_v27 }
  0xb3   : > { %v364_v29 = vadd.f32 1e-08, %v362_v28 }
  0xb5   : > { %726 = vrsqrt.f32 %v364_v29  ;;  %vm372_vm2 = vweird.f32 %v364_v29 }
  0xb8   : > { %v354_v30 = vpop.xlane.xlu0 %353 }
  0xb9   : > { %v363_v31 = vmul.f32 %v361_v26, %v354_v30 }
  0xbb   : > { %v727_v32 = vpop.eup %726  ;;  %v365_v33 = vadd.f32 1e-08, %v363_v31 }
  0xbc   : > { %v367_v34 = vmul.f32 %v727_v32, %v364_v29  ;;  %vm373_vm1 = vweird.f32 %v727_v32 }
  0xbd   : > { %728 = vrsqrt.f32 %v365_v33  ;;  %vm374_vm3 = vmor %vm372_vm2, %vm373_vm1  ;;  %vm382_vm5 = vweird.f32 %v365_v33 }
  0xbe   : > { %v368_v35 = vmul.f32 %v727_v32, %v367_v34 }
  0xc0   : > { %v369_v36 = vmul.f32 0.5, %v368_v35 }
  0xc2   : > { %v370_v37 = vsub.f32 1.5, %v369_v36 }
  0xc3   : > { %v729_v38 = vpop.eup %728 }
  0xc4   : > { %v377_v39 = vmul.f32 %v729_v38, %v365_v33  ;;  %v371_v40 = vmul.f32 %v727_v32, %v370_v37  ;;  %vm383_vm4 = vweird.f32 %v729_v38 }
  0xc5   : > { %vm384_vm6 = vmor %vm382_vm5, %vm383_vm4 }
  0xc6   : > { %v378_v42 = vmul.f32 %v729_v38, %v377_v39  ;;  %v375_v43 = vsel %vm374_vm3, %v727_v32, %v371_v40 }
  0xc7   : > { %v386_v44 = vmul.f32 %v375_v43, %v1117_v0 }
  0xc8   : > { %v379_v45 = vmul.f32 0.5, %v378_v42 }
  0xc9   : > { %v392_v46 = vmul.f32 %v722_v41, %v386_v44 }
  0xca   : > { %v380_v47 = vsub.f32 1.5, %v379_v45 }
  0xcb   : > { %430 = vmatmul.f32.vlgmr.msra.gmra.mxu0 %v392_v46 }
  0xcc   : > { %v381_v48 = vmul.f32 %v729_v38, %v380_v47 }
  0xce   : > { %v385_v49 = vsel %vm384_vm6, %v729_v38, %v381_v48 }
  0xcf   : > { %v387_v50 = vmul.f32 %v385_v49, %v1124_v5 }
  0xd1   : > { %v393_v51 = vmul.f32 %v722_v41, %v387_v50 }
  0xd3   : > { %433 = vmatmul.f32.vlgmr.msra.gmra.mxu1 %v393_v51 }
 0x148   : > { %v431_v53 = vpop.f32.mrf.mxu0 }
 0x149   : > { %v432_v54 = vadd.f32 %v723_v52, %v431_v53 }
 0x14b   : > { %437 = vst [vmem:[%s344_s25] sm:$0xff] %v432_v54 }
 0x150   : > { %v434_v55 = vpop.f32.mrf.mxu1 }
 0x151   : > { %v435_v56 = vadd.f32 %v723_v52, %v434_v55 }
 0x153   : > { %438 = vst [vmem:[%s344_s25 + $0x8] sm:$0xff] %v435_v56 }
 0x154   : > { %877 = shalt.err (!%p874_p10)
}
 0x155   : > { %s945_s23 = smov 128   ;;  %s946_s17 = smov 8  }
 0x156   : > { %648 = dma.vmem_to_hbm [thread:$0]  (%p1027_p9), %s455_s24, 256, %s457_s8, %s440_s9, %s945_s23, %s945_s23, %s946_s17  }
 0x157 PF: > { %s1210_s15 = sld [smem:[#allocation15_spill]]  ;;  %p668_p12 = scmp.ge.s32.totalorder %s940_s20, 2 }
 0x159   : > { %p664_p13 = pnand %p668_p12, %p1034_p11 }
 0x15b   : > { %p665_p0 = pneg %p664_p13 }
 0x15d   : > { %s471_s30 = sand.u32 1, %s1210_s15  }
 0x15e   : > { %s472_s5 = scalar_lea.sflag [#allocation4], %s471_s30 }
 0x15f   : > { %915 = dma.done.wait (%p665_p0), %s472_s5, 256  }
 0x160   : > { %917 = vsyncadd (%p665_p0), %s472_s5, 4294967040  ;;  %s26_s20 = sadd.s32 1, %s940_s20   ;;  %s1212_s7 = sld [smem:[#allocation16_spill]] }
 0x161   : > { %p23_p1 = scmp.ge.s32.totalorder %s26_s20, 5   ;;  %s1213_s17 = sld [smem:[#allocation18_spill]] }
 0x162   : > { %s1214_s28 = sld [smem:[#allocation17_spill]]  ;;  %s1215_s15 = smov %s924_s16 }
 0x163   : > { %s1217_s18 = smov %s936_s19 }
 0x164   :  { %25 = sbr.rel (!%p23_p1) target bundleno = 13 (0xd), region = 118 }
 0x166   : > { %s1216_s16 = smov %s1212_s7 }
 0x168   : > { %s1218_s19 = smov %s1214_s28 }
 0x169   :  { %478 = vsyncpa [#allocation3], 1 }
 0x16a   :  { %480 = vsyncpa [#allocation3 + $0x1], 1 }
 0x16b   :  { %481 = vsyncpa [#allocation6], 1 }
 0x16c   :  { %483 = vsyncpa [#allocation6 + $0x1], 1 }
 0x16d   :  { %484 = vsyncpa [#allocation9], 1 }
 0x16e   :  { %486 = vsyncpa [#allocation9 + $0x1], 1 }
 0x16f   :  { %487 = vsyncpa [#allocation4], 1 }
 0x170   :  { %489 = vsyncpa [#allocation4 + $0x1], 1 }

</bundles_post_ra>
